<compile_context>
chip_gen: v5e
topology: v5e:2x2
jax: 0.10.0
libtpu: 0.0.40
codegen_flags: <defaults>
</compile_context>

<pallas_src>
import functools

import jax
import jax.numpy as jnp
from jax import lax
from jax.experimental import pallas as pl
from jax.experimental.pallas import tpu as pltpu


# ----------------------------------------------------------------------------
# tiling / VMEM helpers
# ----------------------------------------------------------------------------
_VMEM_CAP = None


def _vmem_cap_bytes():
    global _VMEM_CAP
    if _VMEM_CAP is None:
        try:
            cap = int(pltpu.get_tpu_info().vmem_capacity_bytes)
        except Exception:
            cap = 64 * 1024 * 1024          # assume the smallest (v7x) part
        _VMEM_CAP = (cap * 3) // 4          # leave headroom for the compiler
    return _VMEM_CAP


def _vmem_limit(need_bytes):
    return int(min(_vmem_cap_bytes(), max(2 * need_bytes, 16 * 1024 * 1024)))


def _tile(dim, cap, align):
    """Largest block <= cap that divides `dim` and is `align`-aligned,
    else the full dimension (always legal w.r.t. the (8,128) rule)."""
    if dim <= cap:
        return dim
    t = (cap // align) * align
    while t >= align:
        if dim % t == 0:
            return t
        t -= align
    return dim


def _pad_and_tile(dim, cap, align):
    """Return (padded_dim, tile); pads instead of silently using a huge
    full-dim block when `dim` is large with no aligned divisor <= cap."""
    if dim <= cap:
        return dim, dim
    t = _tile(dim, cap, align)
    if t != dim:
        return dim, t
    t = (cap // align) * align
    return ((dim + t - 1) // t) * t, t


def _pad2d(x, rows, cols, value=0.0):
    r, c = x.shape
    if r == rows and c == cols:
        return x
    return jnp.pad(x, ((0, rows - r), (0, cols - c)), constant_values=value)


# ----------------------------------------------------------------------------
# linear kernels
# ----------------------------------------------------------------------------
def _linear_kernel(x_ref, w_ref, b_ref, o_ref, *, gelu):
    # K fits in one tile: accumulate straight into the output block.
    y = jnp.dot(x_ref[...], w_ref[...], preferred_element_type=jnp.float32)
    y = y + b_ref[...].astype(jnp.float32)
    if gelu:
        y = jax.nn.gelu(y, approximate=True)      # tanh-approx (EUP friendly)
    o_ref[...] = y.astype(o_ref.dtype)


def _linear_kernel_ktiled(x_ref, w_ref, b_ref, o_ref, acc_ref, *, gelu):
    @pl.when(pl.program_id(2) == 0)
    def _():
        acc_ref[...] = jnp.zeros_like(acc_ref)

    acc_ref[...] += jnp.dot(x_ref[...], w_ref[...],
                            preferred_element_type=jnp.float32)

    @pl.when(pl.program_id(2) == pl.num_programs(2) - 1)
    def _():
        y = acc_ref[...] + b_ref[...].astype(jnp.float32)
        if gelu:
            y = jax.nn.gelu(y, approximate=True)
        o_ref[...] = y.astype(o_ref.dtype)


def pallas_linear(x, w, b, gelu=False, out_dtype=jnp.bfloat16,
                  compute_dtype=jnp.bfloat16):
    m, k = x.shape
    k2, n = w.shape
    assert k == k2
    mp, tm = _pad_and_tile(m, 512, 16)
    np_, tn = _pad_and_tile(n, 256, 128)
    kp, tk = _pad_and_tile(k, 2048, 128)

    xc = _pad2d(x.astype(compute_dtype), mp, kp)
    wc = _pad2d(w.astype(compute_dtype), kp, np_)
    bc = _pad2d(b.reshape(1, n).astype(jnp.float32), 1, np_)

    xb = jnp.dtype(compute_dtype).itemsize
    ob = jnp.dtype(out_dtype).itemsize

    if kp == tk:
        # single K tile: 2-D grid, no accumulator scratch, no K pipeline
        need = 2 * (tm * tk * xb + tk * tn * xb + tn * 4) + 2 * tm * tn * ob
        out = pl.pallas_call(
            functools.partial(_linear_kernel, gelu=gelu),
            grid=(mp // tm, np_ // tn),
            in_specs=[pl.BlockSpec((tm, tk), lambda i, j: (i, 0)),
                      pl.BlockSpec((tk, tn), lambda i, j: (0, j)),
                      pl.BlockSpec((1, tn), lambda i, j: (0, j))],
            out_specs=pl.BlockSpec((tm, tn), lambda i, j: (i, j)),
            out_shape=jax.ShapeDtypeStruct((mp, np_), out_dtype),
            compiler_params=pltpu.CompilerParams(
                dimension_semantics=("parallel", "parallel"),
                vmem_limit_bytes=_vmem_limit(need)),
        )(xc, wc, bc)
    else:
        need = (2 * (tm * tk * xb + tk * tn * xb + tn * 4)
                + 2 * tm * tn * ob + tm * tn * 4)
        out = pl.pallas_call(
            functools.partial(_linear_kernel_ktiled, gelu=gelu),
            grid=(mp // tm, np_ // tn, kp // tk),
            in_specs=[pl.BlockSpec((tm, tk), lambda i, j, kk: (i, kk)),
                      pl.BlockSpec((tk, tn), lambda i, j, kk: (kk, j)),
                      pl.BlockSpec((1, tn), lambda i, j, kk: (0, j))],
            out_specs=pl.BlockSpec((tm, tn), lambda i, j, kk: (i, j)),
            out_shape=jax.ShapeDtypeStruct((mp, np_), out_dtype),
            scratch_shapes=[pltpu.VMEM((tm, tn), jnp.float32)],
            compiler_params=pltpu.CompilerParams(
                dimension_semantics=("parallel", "parallel", "arbitrary"),
                vmem_limit_bytes=_vmem_limit(need)),
        )(xc, wc, bc)

    if mp != m or np_ != n:
        out = out[:m, :n]
    return out


# ----------------------------------------------------------------------------
# fused QKV projection: one x tile feeds three matmuls, three outputs (no split)
# ----------------------------------------------------------------------------
def _qkv_kernel(x_ref, wq_ref, wk_ref, wv_ref, bq_ref, bk_ref, bv_ref,
                q_ref, k_ref, v_ref):
    x = x_ref[...]
    for w_ref, b_ref, o_ref in ((wq_ref, bq_ref, q_ref),
                                (wk_ref, bk_ref, k_ref),
                                (wv_ref, bv_ref, v_ref)):
        y = jnp.dot(x, w_ref[...], preferred_element_type=jnp.float32)
        y = y + b_ref[...].astype(jnp.float32)
        o_ref[...] = y.astype(o_ref.dtype)


def pallas_qkv_linear(x, wq, wk, wv, bq, bk, bv,
                      out_dtype=jnp.bfloat16, compute_dtype=jnp.bfloat16):
    m, k = x.shape
    n = wq.shape[1]
    tm = _tile(m, 512, 16)
    tn = _tile(n, 256, 128)

    xc = x.astype(compute_dtype)
    ws = [w.astype(compute_dtype) for w in (wq, wk, wv)]
    bs = [bb.reshape(1, n).astype(jnp.float32) for bb in (bq, bk, bv)]

    xb = jnp.dtype(compute_dtype).itemsize
    ob = jnp.dtype(out_dtype).itemsize
    need = 2 * (tm * k * xb + 3 * k * tn * xb + 3 * tn * 4 + 3 * tm * tn * ob)

    row = pl.BlockSpec((tm, k), lambda i, j: (i, 0))
    wsp = pl.BlockSpec((k, tn), lambda i, j: (0, j))
    bsp = pl.BlockSpec((1, tn), lambda i, j: (0, j))
    osp = pl.BlockSpec((tm, tn), lambda i, j: (i, j))
    return pl.pallas_call(
        _qkv_kernel,
        grid=(m // tm, n // tn),
        in_specs=[row, wsp, wsp, wsp, bsp, bsp, bsp],
        out_specs=(osp, osp, osp),
        out_shape=tuple(jax.ShapeDtypeStruct((m, n), out_dtype) for _ in range(3)),
        compiler_params=pltpu.CompilerParams(
            dimension_semantics=("parallel", "parallel"),
            vmem_limit_bytes=_vmem_limit(need)),
    )(xc, *ws, *bs)


# ----------------------------------------------------------------------------
# LayerNorm (residual add fused in)
# ----------------------------------------------------------------------------
def _layernorm_kernel(x_ref, g_ref, b_ref, o_ref):
    x = x_ref[...].astype(jnp.float32)
    mu = jnp.mean(x, axis=-1, keepdims=True)
    var = jnp.mean((x - mu) ** 2, axis=-1, keepdims=True)
    y = (x - mu) * lax.rsqrt(var + 1e-5)
    o_ref[...] = (y * g_ref[...] + b_ref[...]).astype(o_ref.dtype)


def _add_layernorm_kernel(x_ref, y_ref, g_ref, b_ref, res_ref, o_ref):
    # res = x + y (f32 residual stream), o = LayerNorm(res)
    r = x_ref[...].astype(jnp.float32) + y_ref[...].astype(jnp.float32)
    res_ref[...] = r.astype(res_ref.dtype)
    mu = jnp.mean(r, axis=-1, keepdims=True)
    var = jnp.mean((r - mu) ** 2, axis=-1, keepdims=True)
    yn = (r - mu) * lax.rsqrt(var + 1e-5)
    o_ref[...] = (yn * g_ref[...] + b_ref[...]).astype(o_ref.dtype)


def pallas_layernorm(x, g, b, out_dtype=jnp.bfloat16):
    m, c = x.shape
    tm = _tile(m, 512, 16)
    row = pl.BlockSpec((tm, c), lambda i: (i, 0))
    vec = pl.BlockSpec((1, c), lambda i: (0, 0))
    need = 2 * tm * c * (x.dtype.itemsize + jnp.dtype(out_dtype).itemsize) + 4 * c * 4
    return pl.pallas_call(
        _layernorm_kernel,
        grid=(m // tm,),
        in_specs=[row, vec, vec],
        out_specs=row,
        out_shape=jax.ShapeDtypeStruct((m, c), out_dtype),
        compiler_params=pltpu.CompilerParams(
            dimension_semantics=("parallel",),
            vmem_limit_bytes=_vmem_limit(need)),
    )(x, g.reshape(1, c), b.reshape(1, c))


def pallas_add_layernorm(x, y, g, b, ln_dtype=jnp.bfloat16):
    """Returns (x + y in x.dtype, LayerNorm(x + y) in ln_dtype)."""
    m, c = x.shape
    tm = _tile(m, 512, 16)
    row = pl.BlockSpec((tm, c), lambda i: (i, 0))
    vec = pl.BlockSpec((1, c), lambda i: (0, 0))
    need = 2 * tm * c * (2 * x.dtype.itemsize + y.dtype.itemsize
                         + jnp.dtype(ln_dtype).itemsize) + 4 * c * 4
    res, out = pl.pallas_call(
        _add_layernorm_kernel,
        grid=(m // tm,),
        in_specs=[row, row, vec, vec],
        out_specs=(row, row),
        out_shape=(jax.ShapeDtypeStruct((m, c), x.dtype),
                   jax.ShapeDtypeStruct((m, c), ln_dtype)),
        compiler_params=pltpu.CompilerParams(
            dimension_semantics=("parallel",),
            vmem_limit_bytes=_vmem_limit(need)),
    )(x, y, g.reshape(1, c), b.reshape(1, c))
    return res, out


# ----------------------------------------------------------------------------
# flash-style causal attention (online softmax, masked KV tiles skipped)
# ----------------------------------------------------------------------------
def _flash_attn_kernel(q_ref, k_ref, v_ref, o_ref, m_ref, l_ref, acc_ref,
                       *, n_heads, head_dim, tq, tk):
    qi = pl.program_id(2)
    ki = pl.program_id(3)
    nk = pl.num_programs(3)

    @pl.when(ki == 0)
    def _():
        m_ref[...] = jnp.full_like(m_ref, -1e30)
        l_ref[...] = jnp.zeros_like(l_ref)
        acc_ref[...] = jnp.zeros_like(acc_ref)

    # skip KV tiles that lie entirely above the causal diagonal
    @pl.when(ki * tk <= qi * tq + (tq - 1))
    def _():
        scale = 1.0 / (head_dim ** 0.5)
        rows = qi * tq + lax.broadcasted_iota(jnp.int32, (tq, 1), 0)
        cols = ki * tk + lax.broadcasted_iota(jnp.int32, (1, tk), 1)
        causal = cols <= rows                                  # (tq, tk)
        for h in range(n_heads):                               # static unroll
            sl = slice(h * head_dim, (h + 1) * head_dim)
            s = lax.dot_general(q_ref[:, sl], k_ref[:, sl],
                                (((1,), (1,)), ((), ())),
                                preferred_element_type=jnp.float32) * scale
            s = jnp.where(causal, s, -1e30)                    # large negative
            m_prev = m_ref[:, h:h + 1]
            m_new = jnp.maximum(m_prev, jnp.max(s, axis=-1, keepdims=True))
            alpha = jnp.exp(m_prev - m_new)
            p = jnp.exp(s - m_new)                             # f32 softmax stats
            l_ref[:, h:h + 1] = alpha * l_ref[:, h:h + 1] + jnp.sum(
                p, axis=-1, keepdims=True)
            acc_ref[:, sl] = alpha * acc_ref[:, sl] + jnp.dot(
                p.astype(v_ref.dtype), v_ref[:, sl],
                preferred_element_type=jnp.float32)
            m_ref[:, h:h + 1] = m_new

    @pl.when(ki == nk - 1)
    def _():
        for h in range(n_heads):
            sl = slice(h * head_dim, (h + 1) * head_dim)
            inv = pl.reciprocal(l_ref[:, h:h + 1], approx=True)   # EUP reciprocal
            acc_ref[:, sl] = acc_ref[:, sl] * inv
        o_ref[...] = acc_ref[...].astype(o_ref.dtype)             # one dense store


def pallas_causal_attention(q, k, v, n_head):
    """q, k, v, out are (b, t, n_head*dh) — heads live in the lane dim."""
    bsz, t, c = q.shape
    dh = c // n_head
    # head-group width: smallest multiple-of-128-lane group, else all heads.
    hg = n_head
    for g in range(1, n_head + 1):
        if n_head % g == 0 and (g * dh) % 128 == 0:
            hg = g
            break
    gw = hg * dh
    n_groups = c // gw
    tq = _tile(t, 128, 16)
    tk = _tile(t, 128, 16)

    qspec = pl.BlockSpec((None, tq, gw), lambda bb, gg, qi, ki: (bb, qi, gg))
    kvspec = pl.BlockSpec((None, tk, gw), lambda bb, gg, qi, ki: (bb, ki, gg))
    ospec = pl.BlockSpec((None, tq, gw), lambda bb, gg, qi, ki: (bb, qi, gg))

    eb = q.dtype.itemsize
    need = (2 * (tq * gw + 2 * tk * gw + tq * gw) * eb
            + tq * gw * 4 + 2 * tq * hg * 4 + 4 * tq * tk * 4)

    kernel = functools.partial(_flash_attn_kernel, n_heads=hg, head_dim=dh,
                               tq=tq, tk=tk)
    return pl.pallas_call(
        kernel,
        grid=(bsz, n_groups, t // tq, t // tk),
        in_specs=[qspec, kvspec, kvspec],
        out_specs=ospec,
        out_shape=jax.ShapeDtypeStruct((bsz, t, c), q.dtype),
        scratch_shapes=[pltpu.VMEM((tq, hg), jnp.float32),
                        pltpu.VMEM((tq, hg), jnp.float32),
                        pltpu.VMEM((tq, gw), jnp.float32)],
        compiler_params=pltpu.CompilerParams(
            dimension_semantics=("parallel", "parallel", "parallel", "arbitrary"),
            vmem_limit_bytes=_vmem_limit(need)),
    )(q, k, v)


# ----------------------------------------------------------------------------
# masked cross entropy (vocab-tiled, online log-sum-exp)
# ----------------------------------------------------------------------------
def _cross_entropy_kernel(logits_ref, tgt_ref, mask_ref,
                          loss_sum_ref, cnt_ref,
                          m_ref, l_ref, tl_ref, *, tv):
    i = pl.program_id(0)
    vi = pl.program_id(1)
    nv = pl.num_programs(1)

    @pl.when(jnp.logical_and(i == 0, vi == 0))
    def _():
        loss_sum_ref[...] = jnp.zeros_like(loss_sum_ref)
        cnt_ref[...] = jnp.zeros_like(cnt_ref)

    @pl.when(vi == 0)
    def _():
        m_ref[...] = jnp.full_like(m_ref, -1e30)
        l_ref[...] = jnp.zeros_like(l_ref)
        tl_ref[...] = jnp.zeros_like(tl_ref)

    x = logits_ref[...].astype(jnp.float32)               # (tm, tv)
    n, v = x.shape
    cols = vi * tv + lax.broadcasted_iota(jnp.int32, (n, v), 1)
    tgt = tgt_ref[...]                                     # (tm, 1) int32
    tl_ref[...] += jnp.sum(jnp.where(cols == tgt, x, 0.0), axis=-1, keepdims=True)

    m_prev = m_ref[...]
    m_new = jnp.maximum(m_prev, jnp.max(x, axis=-1, keepdims=True))
    l_ref[...] = (l_ref[...] * jnp.exp(m_prev - m_new)
                  + jnp.sum(jnp.exp(x - m_new), axis=-1, keepdims=True))
    m_ref[...] = m_new

    @pl.when(vi == nv - 1)
    def _():
        lse = m_ref[...] + jnp.log(l_ref[...])
        per_row = (lse - tl_ref[...]) * mask_ref[...]      # (tm, 1)
        loss_sum_ref[...] += jnp.sum(per_row, axis=0, keepdims=True)
        cnt_ref[...] += jnp.sum(mask_ref[...], axis=0, keepdims=True)


def pallas_masked_cross_entropy(logits2d, targets2d, masks2d):
    """Returns (sum(loss*mask), sum(mask)) as (1,1) f32 arrays."""
    n, v = logits2d.shape
    tm = _tile(n, 256, 8)
    vp, tv = _pad_and_tile(v, 2048, 128)
    lg = logits2d
    if vp != v:
        # padded vocab columns get -1e30 (exp -> 0); targets never point there.
        lg = jnp.pad(lg, ((0, 0), (0, vp - v)), constant_values=-1e30)

    need = 2 * (tm * tv * 4 + 2 * tm * 4) + 3 * tm * 4 + 16
    scalar = pl.BlockSpec((1, 1), lambda i, vi: (0, 0))
    return pl.pallas_call(
        functools.partial(_cross_entropy_kernel, tv=tv),
        grid=(n // tm, vp // tv),
        in_specs=[pl.BlockSpec((tm, tv), lambda i, vi: (i, vi)),
                  pl.BlockSpec((tm, 1), lambda i, vi: (i, 0)),
                  pl.BlockSpec((tm, 1), lambda i, vi: (i, 0))],
        out_specs=(scalar, scalar),
        out_shape=(jax.ShapeDtypeStruct((1, 1), jnp.float32),
                   jax.ShapeDtypeStruct((1, 1), jnp.float32)),
        scratch_shapes=[pltpu.VMEM((tm, 1), jnp.float32),
                        pltpu.VMEM((tm, 1), jnp.float32),
                        pltpu.VMEM((tm, 1), jnp.float32)],
        compiler_params=pltpu.CompilerParams(
            dimension_semantics=("arbitrary", "arbitrary"),
            vmem_limit_bytes=_vmem_limit(need)),
    )(lg, targets2d, masks2d)


# ----------------------------------------------------------------------------
# Embedder / sequence (glue, mirrors the torch code)
# ----------------------------------------------------------------------------
def embed(lookup_table, data):
    B, E, T, C = data.shape
    n_embd = lookup_table.shape[-1]
    if C > 1:
        # TODO(synk): ResNetV2 image embedding path not implemented.
        raise NotImplementedError("image modality not supported in this kernel")
    idx = data.reshape(B * E * T)
    # dummy = sum(p.sum()*0 for image params) == 0, so lookup result is exact.
    return jnp.take(lookup_table, idx, axis=0).reshape(B, E, T, n_embd)


def sequence_fn(lookup_table, xs, ys=None, ms=None, sequence_length=1024, pad=True):
    embs = jnp.concatenate([embed(lookup_table, v) for v in xs.values()], axis=2)
    B, E, T, C = embs.shape
    embs = embs.reshape(B, E * T, C)
    if ys is not None:
        targets = jnp.concatenate(list(ys.values()), axis=2).reshape(B, E * T)
        if ms is not None:
            masks = jnp.concatenate(list(ms.values()), axis=2).reshape(B, E * T)
        else:
            masks = jnp.ones(targets.shape, dtype=jnp.float32)
        if pad:
            p = sequence_length - embs.shape[1]
            embs = jnp.pad(embs, ((0, 0), (0, p), (0, 0)))
            targets = jnp.pad(targets, ((0, 0), (0, p))).astype(jnp.int32)
            masks = jnp.pad(masks, ((0, 0), (0, p)))
        return embs, targets.astype(jnp.int32), masks
    if pad:
        p = sequence_length - embs.shape[1]
        embs = jnp.pad(embs, ((0, 0), (0, p), (0, 0)))
    return embs


# ----------------------------------------------------------------------------
# GPT transformer + full Mugato forward
# ----------------------------------------------------------------------------
def mugato_forward(params, xs, ys=None, ms=None, pad=True):
    cfg = params["config"]
    if ys is not None:
        assert ms is not None
        tok_emb, targets, masks = sequence_fn(
            params["wte"], xs, ys, ms, sequence_length=cfg["block_size"], pad=pad)
    else:
        tok_emb = sequence_fn(params["wte"], xs,
                              sequence_length=cfg["block_size"], pad=pad)
        targets = masks = None

    b, t, c = tok_emb.shape
    n_head = cfg["n_head"]
    # f32 residual stream; drop() = identity
    x = (tok_emb + params["wpe"][None, :t, :]).reshape(b * t, c)

    pending = None   # MLP branch not yet added to the residual stream
    for blk in params["blocks"]:
        # LN1, fused with the previous block's pending residual add
        if pending is None:
            h = pallas_layernorm(x, blk["ln1_g"], blk["ln1_b"])
        else:
            x, h = pallas_add_layernorm(x, pending, blk["ln1_g"], blk["ln1_b"])

        # attention sub-block: fused 3-output QKV projection, flash attention
        q, k, v = pallas_qkv_linear(
            h, blk["attn_wq"], blk["attn_wk"], blk["attn_wv"],
            blk["attn_bq"], blk["attn_bk"], blk["attn_bv"])
        y = pallas_causal_attention(q.reshape(b, t, c), k.reshape(b, t, c),
                                    v.reshape(b, t, c), n_head).reshape(b * t, c)
        y = pallas_linear(y, blk["attn_proj_w"], blk["attn_proj_b"])

        # residual add fused into LN2
        x, h = pallas_add_layernorm(x, y, blk["ln2_g"], blk["ln2_b"])

        # MLP sub-block; its residual add is fused into the *next* LayerNorm
        h = pallas_linear(h, blk["fc_w"], blk["fc_b"], gelu=True)
        pending = pallas_linear(h, blk["mlp_proj_w"], blk["mlp_proj_b"])

    if pending is None:
        h = pallas_layernorm(x, params["ln_f_g"], params["ln_f_b"])
    else:
        x, h = pallas_add_layernorm(x, pending, params["ln_f_g"], params["ln_f_b"])

    logits2 = pallas_linear(h, params["lm_head_w"], params["lm_head_b"],
                            out_dtype=jnp.float32)
    logits = logits2.reshape(b, t, cfg["vocab_size"])

    loss = None
    if ys is not None:
        loss_sum, mask_sum = pallas_masked_cross_entropy(
            logits2, targets.reshape(-1, 1),
            masks.reshape(-1, 1).astype(jnp.float32))
        loss = loss_sum[0, 0] / mask_sum[0, 0]
    return logits, loss


# ----------------------------------------------------------------------------
# pure-JAX reference (f32 end-to-end) for a numerical sanity check
# ----------------------------------------------------------------------------
def _ref_ln(x, g, b):
    mu = jnp.mean(x, -1, keepdims=True)
    var = jnp.mean((x - mu) ** 2, -1, keepdims=True)
    return (x - mu) * lax.rsqrt(var + 1e-5) * g + b


def reference_forward(params, xs, ys=None, ms=None, pad=True):
    cfg = params["config"]
    if ys is not None:
        tok_emb, targets, masks = sequence_fn(
            params["wte"], xs, ys, ms, sequence_length=cfg["block_size"], pad=pad)
    else:
        tok_emb = sequence_fn(params["wte"], xs,
                              sequence_length=cfg["block_size"], pad=pad)
        targets = masks = None
    b, t, c = tok_emb.shape
    nh = cfg["n_head"]
    dh = c // nh
    x = tok_emb + params["wpe"][None, :t, :]
    for blk in params["blocks"]:
        h = _ref_ln(x, blk["ln1_g"], blk["ln1_b"])
        q = h @ blk["attn_wq"] + blk["attn_bq"]
        k = h @ blk["attn_wk"] + blk["attn_bk"]
        v = h @ blk["attn_wv"] + blk["attn_bv"]
        q = q.reshape(b, t, nh, dh).transpose(0, 2, 1, 3)
        k = k.reshape(b, t, nh, dh).transpose(0, 2, 1, 3)
        v = v.reshape(b, t, nh, dh).transpose(0, 2, 1, 3)
        s = (q @ k.transpose(0, 1, 3, 2)) / (dh ** 0.5)
        causal = jnp.tril(jnp.ones((t, t), bool))
        s = jnp.where(causal, s, -jnp.inf)
        p = jax.nn.softmax(s, axis=-1)
        y = (p @ v).transpose(0, 2, 1, 3).reshape(b, t, c)
        x = x + (y @ blk["attn_proj_w"] + blk["attn_proj_b"])
        h = _ref_ln(x, blk["ln2_g"], blk["ln2_b"])
        h = jax.nn.gelu(h @ blk["fc_w"] + blk["fc_b"], approximate=True)
        x = x + (h @ blk["mlp_proj_w"] + blk["mlp_proj_b"])
    x = _ref_ln(x, params["ln_f_g"], params["ln_f_b"])
    logits = x @ params["lm_head_w"] + params["lm_head_b"]
    loss = None
    if ys is not None:
        lg = logits.reshape(-1, logits.shape[-1])
        tg = targets.reshape(-1)
        lse = jax.nn.logsumexp(lg, axis=-1)
        nll = lse - jnp.take_along_axis(lg, tg[:, None], axis=-1)[:, 0]
        m = masks.reshape(-1)
        loss = jnp.sum(nll * m) / jnp.sum(m)
    return logits, loss


# ----------------------------------------------------------------------------
# deterministic parameter init (GPT-style: N(0, 0.02) weights, zero biases)
# ----------------------------------------------------------------------------
def init_params(key, cfg):
    n_embd, vocab, block = cfg["n_embd"], cfg["vocab_size"], cfg["block_size"]

    def normal(k, shape):
        return (0.02 * jax.random.normal(k, shape)).astype(jnp.float32)

    keys = jax.random.split(key, 4 + 6 * cfg["n_layer"])
    params = {
        "config": cfg,
        "wte": normal(keys[0], (vocab, n_embd)),
        "wpe": normal(keys[1], (block, n_embd)),
        "ln_f_g": jnp.ones((n_embd,), jnp.float32),
        "ln_f_b": jnp.zeros((n_embd,), jnp.float32),
        "lm_head_w": normal(keys[2], (n_embd, vocab)),
        "lm_head_b": jnp.zeros((vocab,), jnp.float32),
        "blocks": [],
    }
    for i in range(cfg["n_layer"]):
        kq, kk, kv, kp, kf, km = jax.random.split(keys[4 + i], 6)
        params["blocks"].append({
            "ln1_g": jnp.ones((n_embd,), jnp.float32),
            "ln1_b": jnp.zeros((n_embd,), jnp.float32),
            "attn_wq": normal(kq, (n_embd, n_embd)),
            "attn_wk": normal(kk, (n_embd, n_embd)),
            "attn_wv": normal(kv, (n_embd, n_embd)),
            "attn_bq": jnp.zeros((n_embd,), jnp.float32),
            "attn_bk": jnp.zeros((n_embd,), jnp.float32),
            "attn_bv": jnp.zeros((n_embd,), jnp.float32),
            "attn_proj_w": normal(kp, (n_embd, n_embd)),
            "attn_proj_b": jnp.zeros((n_embd,), jnp.float32),
            "ln2_g": jnp.ones((n_embd,), jnp.float32),
            "ln2_b": jnp.zeros((n_embd,), jnp.float32),
            "fc_w": normal(kf, (n_embd, 4 * n_embd)),
            "fc_b": jnp.zeros((4 * n_embd,), jnp.float32),
            "mlp_proj_w": normal(km, (4 * n_embd, n_embd)),
            "mlp_proj_b": jnp.zeros((n_embd,), jnp.float32),
        })
    return params


# ----------------------------------------------------------------------------
if __name__ == "__main__":
    cfg = dict(vocab_size=128, n_embd=32, n_head=4, n_layer=2, block_size=32)
    params = init_params(jax.random.PRNGKey(0), cfg)

    B, E, T = 2, 1, 8
    kx, ky = jax.random.split(jax.random.PRNGKey(0))
    tokens = jax.random.randint(kx, (B, E, T, 1), 0, cfg["vocab_size"], dtype=jnp.int32)
    targets = jax.random.randint(ky, (B, E, T), 0, cfg["vocab_size"], dtype=jnp.int32)
    masks = jnp.ones((B, E, T), dtype=jnp.float32)

    xs = {"text": tokens}
    ys = {"text": targets}
    ms = {"text": masks}

    logits, loss = mugato_forward(params, xs, ys, ms, pad=True)
    (logits, loss) = jax.block_until_ready((logits, loss))

    assert logits.shape == (B, cfg["block_size"], cfg["vocab_size"]), logits.shape
    assert bool(jnp.isfinite(loss)), loss

    # numerical sanity check against a pure-JAX f32 reference (bf16 activations,
    # bf16 MXU and approx reciprocal introduce small, bounded differences)
    ref_logits, ref_loss = reference_forward(params, xs, ys, ms, pad=True)
    max_err = float(jnp.max(jnp.abs(logits - ref_logits)))
    loss_err = abs(float(loss) - float(ref_loss))
    assert max_err < 5e-2, max_err
    assert loss_err < 5e-2, loss_err

    # also exercise the inference path (ys=None -> loss is None)
    logits2, loss2 = mugato_forward(params, xs, pad=True)
    jax.block_until_ready(logits2)
    assert loss2 is None

    print("KERNEL_OK")
</pallas_src>

<mosaic_0001>
module attributes {stable_mosaic.version = 11 : i64} {
  func.func @_layernorm_kernel(%arg0: i32, %arg1: memref<64x32xf32, #tpu.memory_space<vmem>>, %arg2: memref<1x32xf32, #tpu.memory_space<vmem>>, %arg3: memref<1x32xf32, #tpu.memory_space<vmem>>, %arg4: memref<64x32xbf16, #tpu.memory_space<vmem>>) attributes {dimension_semantics = [#tpu.dimension_semantics<parallel>], iteration_bounds = array<i64: 1>, scalar_prefetch = 0 : i64, scratch_operands = 0 : i64, tpu.core_type = #tpu.core_type<tc>, window_params = [{transform_indices = @transform_0, window_bounds = array<i64: 64, 32>}, {pipeline_mode = #tpu.pipeline_mode<synchronous>, transform_indices = @transform_1, window_bounds = array<i64: 1, 32>}, {pipeline_mode = #tpu.pipeline_mode<synchronous>, transform_indices = @transform_2, window_bounds = array<i64: 1, 32>}, {transform_indices = @transform_3, window_bounds = array<i64: 64, 32>}]} {
    %c0 = arith.constant 0 : index
    %c0_0 = arith.constant 0 : index
    %0 = vector.load %arg1[%c0, %c0_0] : memref<64x32xf32, #tpu.memory_space<vmem>>, vector<64x32xf32>
    %cst = arith.constant dense<0.000000e+00> : vector<64xf32>
    %1 = vector.multi_reduction <add>, %0, %cst [1] : vector<64x32xf32> to vector<64xf32>
    %2 = vector.shape_cast %1 : vector<64xf32> to vector<64x1xf32>
    %cst_1 = arith.constant 3.200000e+01 : f32
    %3 = vector.broadcast %cst_1 : f32 to vector<64x1xf32>
    %4 = arith.divf %2, %3 : vector<64x1xf32>
    %5 = vector.broadcast %4 : vector<64x1xf32> to vector<64x32xf32>
    %6 = arith.subf %0, %5 : vector<64x32xf32>
    %7 = arith.mulf %6, %6 : vector<64x32xf32>
    %cst_2 = arith.constant dense<0.000000e+00> : vector<64xf32>
    %8 = vector.multi_reduction <add>, %7, %cst_2 [1] : vector<64x32xf32> to vector<64xf32>
    %9 = vector.shape_cast %8 : vector<64xf32> to vector<64x1xf32>
    %cst_3 = arith.constant 3.200000e+01 : f32
    %10 = vector.broadcast %cst_3 : f32 to vector<64x1xf32>
    %11 = arith.divf %9, %10 : vector<64x1xf32>
    %12 = vector.broadcast %4 : vector<64x1xf32> to vector<64x32xf32>
    %13 = arith.subf %0, %12 : vector<64x32xf32>
    %cst_4 = arith.constant 9.99999974E-6 : f32
    %14 = vector.broadcast %cst_4 : f32 to vector<64x1xf32>
    %15 = arith.addf %11, %14 : vector<64x1xf32>
    %16 = math.rsqrt %15 : vector<64x1xf32>
    %17 = vector.broadcast %16 : vector<64x1xf32> to vector<64x32xf32>
    %18 = arith.mulf %13, %17 : vector<64x32xf32>
    %c0_5 = arith.constant 0 : index
    %c0_6 = arith.constant 0 : index
    %19 = vector.load %arg2[%c0_5, %c0_6] : memref<1x32xf32, #tpu.memory_space<vmem>>, vector<1x32xf32>
    %20 = vector.broadcast %19 : vector<1x32xf32> to vector<64x32xf32>
    %21 = arith.mulf %18, %20 : vector<64x32xf32>
    %c0_7 = arith.constant 0 : index
    %c0_8 = arith.constant 0 : index
    %22 = vector.load %arg3[%c0_7, %c0_8] : memref<1x32xf32, #tpu.memory_space<vmem>>, vector<1x32xf32>
    %23 = vector.broadcast %22 : vector<1x32xf32> to vector<64x32xf32>
    %24 = arith.addf %21, %23 : vector<64x32xf32>
    %25 = arith.truncf %24 : vector<64x32xf32> to vector<64x32xbf16>
    %c0_9 = arith.constant 0 : index
    %c0_10 = arith.constant 0 : index
    %26 = vector.load %arg4[%c0_9, %c0_10] : memref<64x32xbf16, #tpu.memory_space<vmem>>, vector<64x32xbf16>
    tpu.vector_store %arg4[%c0_9, %c0_10], %25 {strides = array<i32>} : memref<64x32xbf16, #tpu.memory_space<vmem>>, vector<64x32xbf16>,
    return
  }
  func.func @transform_0(%arg0: i32) -> (i32, i32) {
    %c0_i32 = arith.constant 0 : i32
    %c0_i32_0 = arith.constant 0 : i32
    return %arg0, %c0_i32 : i32, i32
  }
  func.func @transform_1(%arg0: i32) -> (i32, i32) {
    %c0_i32 = arith.constant 0 : i32
    %c0_i32_0 = arith.constant 0 : i32
    %c0_i32_1 = arith.constant 0 : i32
    return %c0_i32, %c0_i32_0 : i32, i32
  }
  func.func @transform_2(%arg0: i32) -> (i32, i32) {
    %c0_i32 = arith.constant 0 : i32
    %c0_i32_0 = arith.constant 0 : i32
    %c0_i32_1 = arith.constant 0 : i32
    return %c0_i32, %c0_i32_0 : i32, i32
  }
  func.func @transform_3(%arg0: i32) -> (i32, i32) {
    %c0_i32 = arith.constant 0 : i32
    %c0_i32_0 = arith.constant 0 : i32
    return %arg0, %c0_i32 : i32, i32
  }
}

</mosaic_0001>

<bundles_post_ra>
// kernel: tpu_custom_call.1
= control target key start
LH: loop header
LB: loop body
LE: loop exit
PB: predicated region body
PF: predicated region fallthrough
CT: control target
= control target key end

     0   :  { %vm22_vm0 = vcmask 261120   ;;  %v272_v16 = vmov 32.0   ;;  %vm238_vm5 = vcmask 257024   ;;  %s488_s0 = inlined_call_operand.vmem [shape: f32[64,32], index: 0, kind: input, shape index: {}]   ;;  %s489_s1 = inlined_call_operand.vmem [shape: f32[1,32], index: 1, kind: input, shape index: {}]   ;;  %s490_s2 = inlined_call_operand.vmem [shape: f32[1,32], index: 2, kind: input, shape index: {}]   ;;  %s491_s3 = inlined_call_operand.vmem [shape: bf16[64,32], index: 3, kind: output, shape index: {}]  }
   0x1   :  { %v18_v0 = vld [vmem:[%s488_s0 + $0x20] sm:$0xff]  ;;  %v16_v1 = vld [vmem:[%s488_s0 + $0x10] sm:$0xff]  ;;  %v19_v6 = vld [vmem:[%s488_s0 + $0x28] sm:$0xff]  ;;  %254 = vrcp.f32 %v272_v16 }
   0x2   :  { %v14_v2 = vld [vmem:[%s488_s0] sm:$0xff]  ;;  %v35_v3 = vsel %vm22_vm0, %v18_v0, 0.0  ;;  %v29_v4 = vsel %vm22_vm0, %v16_v1, 0.0  ;;  %v17_v7 = vld [vmem:[%s488_s0 + $0x18] sm:$0xff]  ;;  %v15_v8 = vld [vmem:[%s488_s0 + $0x8] sm:$0xff]  ;;  %v38_v9 = vsel %vm22_vm0, %v19_v6, 0.0 }
   0x3   :  { %v23_v5 = vsel %vm22_vm0, %v14_v2, 0.0  ;;  %36 = vadd.xlane.f32.xlu2 %v35_v3  ;;  %30 = vadd.xlane.f32.xlu1 %v29_v4  ;;  %v32_v10 = vsel %vm22_vm0, %v17_v7, 0.0  ;;  %v26_v11 = vsel %vm22_vm0, %v15_v8, 0.0  ;;  %v21_v12 = vld [vmem:[%s488_s0 + $0x38] sm:$0xff]  ;;  %v20_v13 = vld [vmem:[%s488_s0 + $0x30] sm:$0xff] }
   0x4   :  { %24 = vadd.xlane.f32.xlu0 %v23_v5  ;;  %v44_v14 = vsel %vm22_vm0, %v21_v12, 0.0  ;;  %v41_v15 = vsel %vm22_vm0, %v20_v13, 0.0 }
   0x7   :  { %v255_v17 = vpop.eup %254 }
   0x8   :  { %v48_v18 = vmul.f32 32.0, %v255_v17  ;;  %vm52_vm1 = vweird.f32 %v255_v17 }
   0xa   :  { %v49_v19 = vsub.f32 1.0, %v48_v18 }
   0xb   :  { %39 = vadd.xlane.f32.xlu2 %v38_v9  ;;  %33 = vadd.xlane.f32.xlu1 %v32_v10 }
   0xc   :  { %27 = vadd.xlane.f32.xlu0 %v26_v11  ;;  %v50_v20 = vmul.f32 %v255_v17, %v49_v19 }
   0xe   :  { %v51_v21 = vadd.f32 %v255_v17, %v50_v20 }
  0x10   :  { %v325_v22 = vsel %vm52_vm1, %v255_v17, %v51_v21 }
  0x13   :  { %45 = vadd.xlane.f32.xlu1 %v44_v14 }
  0x14   :  { %42 = vadd.xlane.f32.xlu0 %v41_v15 }
  0x76   :  { %v37_v23 = vpop.xlane.xlu2 %36  ;;  %v31_v24 = vpop.xlane.xlu1 %30 }
  0x77   :  { %v56_v25 = vmul.f32 %v325_v22, %v31_v24  ;;  %v25_v26 = vpop.xlane.xlu0 %24  ;;  %v58_v39 = vmul.f32 %v325_v22, %v37_v23 }
  0x78   :  { %v54_v27 = vmul.f32 %v325_v22, %v25_v26 }
  0x79   :  { %v329_v28 = vsub.f32 %v16_v1, %v56_v25  ;;  %v353_v46 = vsub.f32 %v18_v0, %v58_v39 }
  0x7a   :  { %v331_v29 = vsub.f32 %v14_v2, %v54_v27 }
  0x7b   :  { %v72_v30 = vmul.f32 %v329_v28, %v329_v28  ;;  %v74_v55 = vmul.f32 %v353_v46, %v353_v46 }
  0x7c   :  { %v70_v31 = vmul.f32 %v331_v29, %v331_v29 }
  0x7d   :  { %v84_v32 = vsel %vm22_vm0, %v72_v30, 0.0  ;;  %v90_v58 = vsel %vm22_vm0, %v74_v55, 0.0 }
  0x7e   :  { %v40_v33 = vpop.xlane.xlu2 %39  ;;  %85 = vadd.xlane.f32.xlu1 %v84_v32  ;;  %v34_v34 = vpop.xlane.xlu1 %33  ;;  %v78_v35 = vsel %vm22_vm0, %v70_v31, 0.0 }
  0x7f   :  { %v59_v36 = vmul.f32 %v325_v22, %v40_v33  ;;  %v57_v37 = vmul.f32 %v325_v22, %v34_v34  ;;  %79 = vadd.xlane.f32.xlu2 %v78_v35  ;;  %v28_v38 = vpop.xlane.xlu0 %27 }
  0x80   :  { %v55_v40 = vmul.f32 %v325_v22, %v28_v38 }
  0x81   :  { %v343_v41 = vsub.f32 %v19_v6, %v59_v36  ;;  %v345_v42 = vsub.f32 %v17_v7, %v57_v37  ;;  %v393_v37 = vld [vmem:[%s489_s1] ss:$0 sm:$0xff] }
  0x82   :  { %v347_v43 = vsub.f32 %v15_v8, %v55_v40 }
  0x83   :  { %v75_v44 = vmul.f32 %v343_v41, %v343_v41  ;;  %v73_v45 = vmul.f32 %v345_v42, %v345_v42 }
  0x84   :  { %v71_v47 = vmul.f32 %v347_v43, %v347_v43 }
  0x85   :  { %v93_v48 = vsel %vm22_vm0, %v75_v44, 0.0  ;;  %v87_v49 = vsel %vm22_vm0, %v73_v45, 0.0 }
  0x86   :  { %94 = vadd.xlane.f32.xlu1 %v93_v48  ;;  %v81_v50 = vsel %vm22_vm0, %v71_v47, 0.0  ;;  %v46_v51 = vpop.xlane.xlu1 %45  ;;  %v403_v48 = vld [vmem:[%s490_s2] ss:$0 sm:$0xff] }
  0x87   :  { %88 = vadd.xlane.f32.xlu2 %v87_v49  ;;  %82 = vadd.xlane.f32.xlu0 %v81_v50  ;;  %v43_v52 = vpop.xlane.xlu0 %42  ;;  %v61_v54 = vmul.f32 %v325_v22, %v46_v51 }
  0x88   :  { %v60_v53 = vmul.f32 %v325_v22, %v43_v52 }
  0x89   :  { %v366_v57 = vsub.f32 %v21_v12, %v61_v54 }
  0x8a   :  { %v364_v56 = vsub.f32 %v20_v13, %v60_v53 }
  0x8b   :  { %v77_v61 = vmul.f32 %v366_v57, %v366_v57 }
  0x8c   :  { %v76_v59 = vmul.f32 %v364_v56, %v364_v56 }
  0x8d   :  { %v99_v62 = vsel %vm22_vm0, %v77_v61, 0.0 }
  0x8e   :  { %v96_v60 = vsel %vm22_vm0, %v76_v59, 0.0 }
  0x8f   :  { %91 = vadd.xlane.f32.xlu0 %v90_v58  ;;  %97 = vadd.xlane.f32.xlu2 %v96_v60 }
  0x97   :  { %100 = vadd.xlane.f32.xlu0 %v99_v62 }
  0xf1   :  { %v86_v63 = vpop.xlane.xlu1 %85 }
  0xf2   :  { %v104_v0 = vmul.f32 %v86_v63, %v325_v22  ;;  %v80_v1 = vpop.xlane.xlu2 %79 }
  0xf3   :  { %v102_v2 = vmul.f32 %v80_v1, %v325_v22 }
  0xf4   :  { %v112_v3 = vadd.f32 1e-05, %v104_v0 }
  0xf5   :  { %v110_v4 = vadd.f32 1e-05, %v102_v2 }
  0xf6   :  { %256 = vrsqrt.f32 %v112_v3  ;;  %vm144_vm2 = vweird.f32 %v112_v3 }
  0xf7   :  { %258 = vrsqrt.f32 %v110_v4  ;;  %vm124_vm7 = vweird.f32 %v110_v4 }
  0xf9   :  { %v95_v5 = vpop.xlane.xlu1 %94 }
  0xfa   :  { %v107_v6 = vmul.f32 %v95_v5, %v325_v22  ;;  %v89_v7 = vpop.xlane.xlu2 %88  ;;  %v83_v8 = vpop.xlane.xlu0 %82 }
  0xfb   :  { %v105_v9 = vmul.f32 %v89_v7, %v325_v22  ;;  %v103_v10 = vmul.f32 %v83_v8, %v325_v22 }
  0xfc   :  { %v257_v11 = vpop.eup %256  ;;  %v115_v12 = vadd.f32 1e-05, %v107_v6 }
  0xfd   :  { %v259_v13 = vpop.eup %258  ;;  %v139_v14 = vmul.f32 %v257_v11, %v112_v3  ;;  %v380_v15 = vadd.f32 1e-05, %v105_v9  ;;  %v382_v16 = vadd.f32 1e-05, %v103_v10  ;;  %vm145_vm3 = vweird.f32 %v257_v11 }
  0xfe   :  { %v119_v17 = vmul.f32 %v259_v13, %v110_v4  ;;  %260 = vrsqrt.f32 %v115_v12  ;;  %vm125_vm4 = vweird.f32 %v259_v13  ;;  %vm146_vm6 = vmor %vm144_vm2, %vm145_vm3  ;;  %vm174_vm9 = vweird.f32 %v115_v12 }
  0xff   :  { %v140_v18 = vmul.f32 %v257_v11, %v139_v14  ;;  %262 = vrsqrt.f32 %v380_v15  ;;  %vm126_vm8 = vmor %vm124_vm7, %vm125_vm4  ;;  %vm154_vm11 = vweird.f32 %v380_v15  ;;  %vm134_vm15 = vweird.f32 %v382_v16 }
 0x100   :  { %v120_v19 = vmul.f32 %v259_v13, %v119_v17  ;;  %264 = vrsqrt.f32 %v382_v16 }
 0x101   :  { %v141_v20 = vmul.f32 0.5, %v140_v18 }
 0x102   :  { %v121_v21 = vmul.f32 0.5, %v120_v19  ;;  %v98_v23 = vpop.xlane.xlu2 %97  ;;  %v92_v24 = vpop.xlane.xlu0 %91 }
 0x103   :  { %v142_v25 = vsub.f32 1.5, %v141_v20  ;;  %v108_v26 = vmul.f32 %v98_v23, %v325_v22  ;;  %v106_v27 = vmul.f32 %v92_v24, %v325_v22 }
 0x104   :  { %v261_v30 = vpop.eup %260  ;;  %v122_v31 = vsub.f32 1.5, %v121_v21 }
 0x105   :  { %v263_v32 = vpop.eup %262  ;;  %v143_v33 = vmul.f32 %v257_v11, %v142_v25  ;;  %v169_v34 = vmul.f32 %v261_v30, %v115_v12  ;;  %v388_v35 = vadd.f32 1e-05, %v108_v26  ;;  %v397_v40 = vadd.f32 1e-05, %v106_v27 }
 0x106   :  { %v265_v36 = vpop.eup %264  ;;  %v123_v38 = vmul.f32 %v259_v13, %v122_v31  ;;  %v149_v39 = vmul.f32 %v263_v32, %v380_v15  ;;  %vm175_vm10 = vweird.f32 %v261_v30  ;;  %vm155_vm13 = vweird.f32 %v263_v32 }
 0x107   :  { %v147_v44 = vsel %vm146_vm6, %v257_v11, %v143_v33  ;;  %v170_v45 = vmul.f32 %v261_v30, %v169_v34  ;;  %v129_v47 = vmul.f32 %v265_v36, %v382_v16  ;;  %266 = vrsqrt.f32 %v388_v35  ;;  %vm415_vm12 = vmor %vm174_vm9, %vm175_vm10 }
 0x108   :  { %v200_v49 = vmul.f32 %v147_v44, %v329_v28  ;;  %v127_v50 = vsel %vm126_vm8, %v259_v13, %v123_v38  ;;  %v150_v51 = vmul.f32 %v263_v32, %v149_v39  ;;  %268 = vrsqrt.f32 %v397_v40  ;;  %vm156_vm0 = vmor %vm154_vm11, %vm155_vm13 }
 0x109   :  { %v198_v52 = vmul.f32 %v127_v50, %v331_v29  ;;  %v171_v53 = vmul.f32 0.5, %v170_v45  ;;  %v130_v54 = vmul.f32 %v265_v36, %v129_v47  ;;  %vm135_vm14 = vweird.f32 %v265_v36 }
 0x10a   :  { %v212_v55 = vmul.f32 %v393_v37, %v200_v49  ;;  %v151_v58 = vmul.f32 0.5, %v150_v51  ;;  %v101_v59 = vpop.xlane.xlu0 %100  ;;  %vm136_vm1 = vmor %vm134_vm15, %vm135_vm14  ;;  %vm184_vm2 = vweird.f32 %v388_v35  ;;  %vm164_vm7 = vweird.f32 %v397_v40 }
 0x10b   :  { %v210_v60 = vmul.f32 %v393_v37, %v198_v52  ;;  %v172_v28 = vsub.f32 1.5, %v171_v53  ;;  %v131_v61 = vmul.f32 0.5, %v130_v54  ;;  %v109_v62 = vmul.f32 %v101_v59, %v325_v22 }
 0x10c   :  { %v224_v63 = vadd.f32 %v403_v48, %v212_v55  ;;  %v152_v0 = vsub.f32 1.5, %v151_v58 }
 0x10d   :  { %v222_v1 = vadd.f32 %v403_v48, %v210_v60  ;;  %v173_v2 = vmul.f32 %v261_v30, %v172_v28  ;;  %v132_v3 = vsub.f32 1.5, %v131_v61  ;;  %v420_v4 = vadd.f32 1e-05, %v109_v62  ;;  %v267_v5 = vpop.eup %266 }
 0x10e   :  { %v232_v6 = vpack.c.bf16 %v224_v63, %v224_v63  ;;  %v153_v7 = vmul.f32 %v263_v32, %v152_v0  ;;  %v179_v10 = vmul.f32 %v267_v5, %v388_v35  ;;  %v269_v11 = vpop.eup %268  ;;  %vm185_vm3 = vweird.f32 %v267_v5 }
 0x10f   :  { %v230_v22 = vpack.c.bf16 %v222_v1, %v222_v1  ;;  %v177_v8 = vsel %vm415_vm12, %v261_v30, %v173_v2  ;;  %v133_v9 = vmul.f32 %v265_v36, %v132_v3  ;;  %270 = vrsqrt.f32 %v420_v4  ;;  %vm186_vm6 = vmor %vm184_vm2, %vm185_vm3 }
 0x110   :  { %241 = vst.msk [vmem:[%s491_s3 + $0x8] sm:$0xf] %vm238_vm5, %v232_v6  ;;  %v203_v12 = vmul.f32 %v177_v8, %v343_v41  ;;  %v157_v13 = vsel %vm156_vm0, %v263_v32, %v153_v7  ;;  %v180_v16 = vmul.f32 %v267_v5, %v179_v10  ;;  %v159_v17 = vmul.f32 %v269_v11, %v397_v40 }
 0x111   :  { %239 = vst.msk [vmem:[%s491_s3] sm:$0xf] %vm238_vm5, %v230_v22  ;;  %v201_v14 = vmul.f32 %v157_v13, %v345_v42  ;;  %v137_v15 = vsel %vm136_vm1, %v265_v36, %v133_v9  ;;  %vm165_vm4 = vweird.f32 %v269_v11  ;;  %vm194_vm10 = vweird.f32 %v420_v4 }
 0x112   :  { %v215_v18 = vmul.f32 %v393_v37, %v203_v12  ;;  %v199_v41 = vmul.f32 %v137_v15, %v347_v43  ;;  %v181_v20 = vmul.f32 0.5, %v180_v16  ;;  %v160_v21 = vmul.f32 %v269_v11, %v159_v17  ;;  %vm166_vm8 = vmor %vm164_vm7, %vm165_vm4 }
 0x113   :  { %v213_v19 = vmul.f32 %v393_v37, %v201_v14 }
 0x114   :  { %v227_v23 = vadd.f32 %v403_v48, %v215_v18  ;;  %v211_v24 = vmul.f32 %v393_v37, %v199_v41  ;;  %v182_v25 = vsub.f32 1.5, %v181_v20  ;;  %v161_v26 = vmul.f32 0.5, %v160_v21 }
 0x115   :  { %v225_v42 = vadd.f32 %v403_v48, %v213_v19  ;;  %v271_v27 = vpop.eup %270 }
 0x116   :  { %v235_v30 = vpack.c.bf16 %v227_v23, %v227_v23  ;;  %v223_v31 = vadd.f32 %v403_v48, %v211_v24  ;;  %v183_v32 = vmul.f32 %v267_v5, %v182_v25  ;;  %v162_v33 = vsub.f32 1.5, %v161_v26 }
 0x117   :  { %v233_v43 = vpack.c.bf16 %v225_v42, %v225_v42  ;;  %v189_v34 = vmul.f32 %v271_v27, %v420_v4  ;;  %vm195_vm9 = vweird.f32 %v271_v27 }
 0x118   :  { %244 = vst.msk [vmem:[%s491_s3 + $0x14] sm:$0xf] %vm238_vm5, %v235_v30  ;;  %v231_v36 = vpack.c.bf16 %v223_v31, %v223_v31  ;;  %v187_v38 = vsel %vm186_vm6, %v267_v5, %v183_v32  ;;  %v163_v39 = vmul.f32 %v269_v11, %v162_v33  ;;  %vm196_vm11 = vmor %vm194_vm10, %vm195_vm9 }
 0x119   :  { %242 = vst.msk [vmem:[%s491_s3 + $0xc] sm:$0xf] %vm238_vm5, %v233_v43  ;;  %v190_v44 = vmul.f32 %v271_v27, %v189_v34  ;;  %v204_v45 = vmul.f32 %v187_v38, %v364_v56 }
 0x11a   :  { %240 = vst.msk [vmem:[%s491_s3 + $0x4] sm:$0xf] %vm238_vm5, %v231_v36  ;;  %v167_v35 = vsel %vm166_vm8, %v269_v11, %v163_v39 }
 0x11b   :  { %v191_v47 = vmul.f32 0.5, %v190_v44  ;;  %v216_v49 = vmul.f32 %v393_v37, %v204_v45  ;;  %v202_v50 = vmul.f32 %v167_v35, %v353_v46 }
 0x11d   :  { %v192_v51 = vsub.f32 1.5, %v191_v47  ;;  %v228_v40 = vadd.f32 %v403_v48, %v216_v49  ;;  %v214_v52 = vmul.f32 %v393_v37, %v202_v50 }
 0x11f   :  { %v193_v53 = vmul.f32 %v271_v27, %v192_v51  ;;  %v236_v54 = vpack.c.bf16 %v228_v40, %v228_v40  ;;  %v226_v56 = vadd.f32 %v403_v48, %v214_v52 }
 0x121   :  { %v197_v55 = vsel %vm196_vm11, %v271_v27, %v193_v53  ;;  %245 = vst.msk [vmem:[%s491_s3 + $0x18] sm:$0xf] %vm238_vm5, %v236_v54  ;;  %v234_v46 = vpack.c.bf16 %v226_v56, %v226_v56 }
 0x122   :  { %v205_v58 = vmul.f32 %v197_v55, %v366_v57 }
 0x123   :  { %243 = vst.msk [vmem:[%s491_s3 + $0x10] sm:$0xf] %vm238_vm5, %v234_v46 }
 0x124   :  { %v217_v59 = vmul.f32 %v393_v37, %v205_v58 }
 0x126   :  { %v229_v60 = vadd.f32 %v403_v48, %v217_v59 }
 0x128   :  { %v237_v28 = vpack.c.bf16 %v229_v60, %v229_v60 }
 0x12a   :  { %246 = vst.msk [vmem:[%s491_s3 + $0x1c] sm:$0xf] %vm238_vm5, %v237_v28 }

</bundles_post_ra>
